<compile_context>
chip_gen: v7x
topology: tpu7x:2x2x1
jax: 0.10.0
libtpu: 0.0.40
codegen_flags: <defaults>
</compile_context>

<pallas_src>
import jax
import jax.numpy as jnp
from jax.experimental import pallas as pl
from jax.experimental.pallas import tpu as pltpu

IN_FEATURES = 16
OUT_FEATURES = 8

_SMALL_BATCH_THRESHOLD = 4096   # below this, fused XLA beats pallas launch overhead
_DEFAULT_TB = 8192              # batch rows per grid step (multiple of 256)


def _round_up(x, m):
    return ((x + m - 1) // m) * m


def linear_add_kernel(w_ref, b_ref, x1_ref, x2_ref, o_ref):
    # w:  (IN, OUT)   VMEM-resident across all grid steps (constant index map)
    # b:  (1, OUT)    VMEM-resident
    # x1: (tb, IN)    natural batch-major tile
    # x2: (tb, OUT)   natural batch-major tile
    # o:  (tb, OUT)
    v1 = jnp.dot(x1_ref[...], w_ref[...], preferred_element_type=jnp.float32)
    o_ref[...] = (v1 + b_ref[...] + x2_ref[...]).astype(o_ref.dtype)


def linear_add(x1, weight, bias, x2, *, tb=_DEFAULT_TB, force_pallas=False):
    """Computes x1 @ weight.T + bias + x2.

    x1:     (B, IN_FEATURES)  float32
    weight: (OUT_FEATURES, IN_FEATURES)   (PyTorch Linear layout)
    bias:   (OUT_FEATURES,)
    x2:     (B, OUT_FEATURES)
    returns (B, OUT_FEATURES)
    """
    B = x1.shape[0]
    x1 = x1.astype(jnp.float32)
    x2 = x2.astype(jnp.float32)
    w_t = weight.astype(jnp.float32).T                       # (IN, OUT), tiny
    b2d = bias.reshape(1, OUT_FEATURES).astype(jnp.float32)  # (1, OUT)

    # Small-batch fast path: for tiny B the pallas_call is pure launch +
    # pipeline overhead; the fused XLA expression is strictly faster and
    # numerically identical.
    if B <= _SMALL_BATCH_THRESHOLD and not force_pallas:
        return x1 @ w_t + b2d + x2

    # Batch tile size: sublane-aligned (multiple of 256), capped so the grid
    # always has >= 2 tiles (megacore sharding on v7x).  No padding of B —
    # Pallas handles the partial last block.
    tb = int(tb)
    tb = min(tb, _round_up(pl.cdiv(B, 2), 256))
    tb = max(tb, 256)
    num_tiles = pl.cdiv(B, tb)

    out = pl.pallas_call(
        linear_add_kernel,
        out_shape=jax.ShapeDtypeStruct((B, OUT_FEATURES), jnp.float32),
        grid=(num_tiles,),
        in_specs=[
            pl.BlockSpec((IN_FEATURES, OUT_FEATURES), lambda i: (0, 0)),  # weight.T
            pl.BlockSpec((1, OUT_FEATURES), lambda i: (0, 0)),            # bias
            pl.BlockSpec((tb, IN_FEATURES), lambda i: (i, 0)),            # x1 tile
            pl.BlockSpec((tb, OUT_FEATURES), lambda i: (i, 0)),           # x2 tile
        ],
        out_specs=pl.BlockSpec((tb, OUT_FEATURES), lambda i: (i, 0)),
        compiler_params=pltpu.CompilerParams(
            dimension_semantics=("parallel",),
            vmem_limit_bytes=48 * 1024 * 1024,  # covers v5e's 16 MiB default; < v7x 64 MiB phys
        ),
    )(w_t, b2d, x1, x2)
    return out


if __name__ == "__main__":
    key = jax.random.PRNGKey(0)
    k1, k2, k3, k4 = jax.random.split(key, 4)

    # Deterministic module parameters: Linear(16, 8), weight.fill_(1), bias.fill_(0).
    weight = jnp.ones((OUT_FEATURES, IN_FEATURES), dtype=jnp.float32)
    bias = jnp.zeros((OUT_FEATURES,), dtype=jnp.float32)

    # Case 1: exact module shapes  x1: (1, 16), x2: (1, 8)  -> small-batch path.
    x1 = jax.random.normal(k1, (1, IN_FEATURES), dtype=jnp.float32)
    x2 = jax.random.normal(k2, (1, OUT_FEATURES), dtype=jnp.float32)
    out = jax.block_until_ready(linear_add(x1, weight, bias, x2))
    ref = x1 @ weight.T + bias + x2
    assert out.shape == (1, OUT_FEATURES)
    assert jnp.allclose(out, ref, atol=1e-5, rtol=1e-5), (out, ref)

    # Case 2: force the Pallas path with a non-multiple-of-tile batch to
    # exercise the multi-tile grid and the partial last block.
    B = 300
    x1b = jax.random.normal(k3, (B, IN_FEATURES), dtype=jnp.float32)
    x2b = jax.random.normal(k4, (B, OUT_FEATURES), dtype=jnp.float32)
    outb = jax.block_until_ready(
        linear_add(x1b, weight, bias, x2b, force_pallas=True))
    refb = x1b @ weight.T + bias + x2b
    assert outb.shape == (B, OUT_FEATURES)
    assert jnp.allclose(outb, refb, atol=1e-4, rtol=1e-4)

    print("KERNEL_OK")
</pallas_src>

<mosaic_0001>
module attributes {stable_mosaic.version = 11 : i64} {
  func.func @linear_add_kernel(%arg0: i32, %arg1: memref<16x8xf32, #tpu.memory_space<vmem>>, %arg2: memref<1x8xf32, #tpu.memory_space<vmem>>, %arg3: memref<256x16xf32, #tpu.memory_space<vmem>>, %arg4: memref<256x8xf32, #tpu.memory_space<vmem>>, %arg5: memref<256x8xf32, #tpu.memory_space<vmem>>) attributes {dimension_semantics = [#tpu.dimension_semantics<parallel>], iteration_bounds = array<i64: 2>, scalar_prefetch = 0 : i64, scratch_operands = 0 : i64, tpu.core_type = #tpu.core_type<tc>, window_params = [{pipeline_mode = #tpu.pipeline_mode<synchronous>, transform_indices = @transform_0, window_bounds = array<i64: 16, 8>}, {pipeline_mode = #tpu.pipeline_mode<synchronous>, transform_indices = @transform_1, window_bounds = array<i64: 1, 8>}, {transform_indices = @transform_2, window_bounds = array<i64: 256, 16>}, {transform_indices = @transform_3, window_bounds = array<i64: 256, 8>}, {transform_indices = @transform_4, window_bounds = array<i64: 256, 8>}]} {
    %c0 = arith.constant 0 : index
    %c0_0 = arith.constant 0 : index
    %0 = vector.load %arg3[%c0, %c0_0] : memref<256x16xf32, #tpu.memory_space<vmem>>, vector<256x16xf32>
    %c0_1 = arith.constant 0 : index
    %c0_2 = arith.constant 0 : index
    %1 = vector.load %arg1[%c0_1, %c0_2] : memref<16x8xf32, #tpu.memory_space<vmem>>, vector<16x8xf32>
    %cst = arith.constant dense<0.000000e+00> : vector<256x8xf32>
    %2 = tpu.matmul %0, %1, %cst {dimension_numbers = #tpu.dot_dimension_numbers<[1], [0], [0], [1], [0, 0, 1, 1], [], []>} : vector<256x16xf32>, vector<16x8xf32>, vector<256x8xf32> -> vector<256x8xf32>
    %c0_3 = arith.constant 0 : index
    %c0_4 = arith.constant 0 : index
    %3 = vector.load %arg2[%c0_3, %c0_4] : memref<1x8xf32, #tpu.memory_space<vmem>>, vector<1x8xf32>
    %4 = vector.broadcast %3 : vector<1x8xf32> to vector<256x8xf32>
    %5 = arith.addf %2, %4 : vector<256x8xf32>
    %c0_5 = arith.constant 0 : index
    %c0_6 = arith.constant 0 : index
    %6 = vector.load %arg4[%c0_5, %c0_6] : memref<256x8xf32, #tpu.memory_space<vmem>>, vector<256x8xf32>
    %7 = arith.addf %5, %6 : vector<256x8xf32>
    %c0_7 = arith.constant 0 : index
    %c0_8 = arith.constant 0 : index
    %8 = vector.load %arg5[%c0_7, %c0_8] : memref<256x8xf32, #tpu.memory_space<vmem>>, vector<256x8xf32>
    tpu.vector_store %arg5[%c0_7, %c0_8], %7 {strides = array<i32>} : memref<256x8xf32, #tpu.memory_space<vmem>>, vector<256x8xf32>,
    return
  }
  func.func @transform_0(%arg0: i32) -> (i32, i32) {
    %c0_i32 = arith.constant 0 : i32
    %c0_i32_0 = arith.constant 0 : i32
    %c0_i32_1 = arith.constant 0 : i32
    return %c0_i32, %c0_i32_0 : i32, i32
  }
  func.func @transform_1(%arg0: i32) -> (i32, i32) {
    %c0_i32 = arith.constant 0 : i32
    %c0_i32_0 = arith.constant 0 : i32
    %c0_i32_1 = arith.constant 0 : i32
    return %c0_i32, %c0_i32_0 : i32, i32
  }
  func.func @transform_2(%arg0: i32) -> (i32, i32) {
    %c0_i32 = arith.constant 0 : i32
    %c0_i32_0 = arith.constant 0 : i32
    return %arg0, %c0_i32 : i32, i32
  }
  func.func @transform_3(%arg0: i32) -> (i32, i32) {
    %c0_i32 = arith.constant 0 : i32
    %c0_i32_0 = arith.constant 0 : i32
    return %arg0, %c0_i32 : i32, i32
  }
  func.func @transform_4(%arg0: i32) -> (i32, i32) {
    %c0_i32 = arith.constant 0 : i32
    %c0_i32_0 = arith.constant 0 : i32
    return %arg0, %c0_i32 : i32, i32
  }
}

</mosaic_0001>

<bundles_post_ra>
// kernel: tpu_custom_call.1
= control target key start
LH: loop header
LB: loop body
LE: loop exit
PB: predicated region body
PF: predicated region fallthrough
CT: control target
= control target key end

     0   :  { %s1427_s15 = smov 0   ;;  %s1429_s16 = smov 0   ;;  %s1823_s0 = inlined_call_operand.vmem [shape: f32[16,8], index: 0, kind: input, shape index: {}]   ;;  %s1824_s1 = inlined_call_operand.vmem [shape: f32[1,8], index: 1, kind: input, shape index: {}]   ;;  %s1825_s2 = inlined_call_operand.vmem [shape: f32[300,16], index: 2, kind: input, shape index: {}]   ;;  %s1826_s3 = inlined_call_operand.vmem [shape: f32[300,8], index: 3, kind: input, shape index: {}]   ;;  %s1827_s4 = inlined_call_operand.vmem [shape: f32[300,8], index: 4, kind: output, shape index: {}]  }
   0x1   :  { %s1431_s17 = smov 0  }
   0x2 LB: > { %s1440_s18 = sadd.s32 4294967295, %s1368_s17   ;;  %s1442_s19 = sadd.s32 1, %s1368_s17   ;;  %s1368_s17 = sphi %s1431_s17, %s1836_s17   ;;  %s1364_s16 = sphi %s1429_s16, %s1835_s16   ;;  %s1360_s15 = sphi %s1427_s15, %s1834_s15  }
   0x3   : > { %s112_s20 = ssub.s32 %s1368_s17, %s1442_s19  ;;  %s115_s21 = sadd.s32 1, %s1364_s16 }
   0x4   : > { %p113_p0 = scmp.eq.s32.totalorder %s112_s20, 0  ;;  %p125_p1 = scmp.ne.s32.totalorder %s1364_s16, %s1360_s15 }
   0x5   : > { %p126_p2 = scmp.eq.s32.totalorder %s1440_s18, 1  ;;  %p1075_p3 = scmp.ge.s32.totalorder %s1368_s17, 1 }
   0x6   : > { %s1450_s22 = scalar_select %p113_p0, %s1364_s16, %s115_s21  }
   0x7   : > { %p1452_p4 = por %p126_p2, %p125_p1  ;;  %p190_p5 = scmp.lt.s32.totalorder %s1368_s17, 3 }
   0x9   : > { %p191_p6 = pnand %p1075_p3, %p190_p5 }
   0xa   : > { %v293_v0 = vld [vmem:[%s1823_s0] sm:$0xff] (!%p191_p6)  ;;  %v294_v1 = vld [vmem:[%s1823_s0 + $0x8] sm:$0xff] (!%p191_p6)  ;;  %s1463_s28 = sshll.u32 (!%p191_p6), %s1440_s18, 5  ;;  %vm302_vm0 = vcmask (!%p191_p6), 130048   ;;  %s225_s8 = sand.u32 (!%p191_p6), 1, %s1360_s15   ;;  %vm688_vm1 = vcmask (!%p191_p6), 64512  }
   0xb   : > { %194 = sbr.rel (%p191_p6) target bundleno = 327 (0x147), region = 36  ;;  %v1220_v2 = vpack.c.bf16 (!%p191_p6), %v294_v1, %v293_v0  ;;  %p233_p7 = scmp.lt.s32.totalorder (!%p191_p6), %s1463_s28, 37  ;;  %v1552_v35 = vld [vmem:[%s1824_s1] ss:$0 sm:$0xff] (!%p191_p6) }
   0xc   : > { %s1076_s14 = sshll.u32 (!%p191_p6), %s225_s8, 8 }
   0xd   : > { %1221 = vmatprep.subr.bf16.mxu0 (!%p191_p6), %v1220_v2  ;;  %1224 = vmatprep.subr.bf16.mxu1 (!%p191_p6), %v1220_v2  ;;  %s1564_s15 = scalar_lea.vmem (!%p191_p6), [#allocation2], %s1076_s14  }
   0xe   : > { %1223 = vmatpush3.bf16.msra.mxu0 (!%p191_p6), %v1220_v2  ;;  %1225 = vmatpush3.bf16.msra.mxu1 (!%p191_p6), %v1220_v2 }
  0x12   : > { %s1467_s29 = scalar_select %p233_p7, %s1463_s28, 37 }
  0x13   : > { %s729_s17 = ssub.s32 (%p1452_p4), 38, %s1463_s28  ;;  %s1131_s20 = sshll.u32 (%p1452_p4), %s1440_s18, 8 }
  0x14   : > { %s1078_s30 = sshll.u32 %s1467_s29, 3  ;;  %p730_p8 = scmp.lt.s32.totalorder (%p1452_p4), %s729_s17, 32 }
  0x15   : > { %s1475_s7 = scalar_lea.vmem %s1825_s2, %s1078_s30  ;;  %s1547_s11 = scalar_lea.vmem %s1826_s3, %s1078_s30 }
  0x16   : > { %v261_v3 = vld [vmem:[%s1475_s7] sm:$0xff]  ;;  %v262_v5 = vld [vmem:[%s1475_s7 + $0x8] sm:$0xff]  ;;  %v263_v7 = vld [vmem:[%s1475_s7 + $0x10] sm:$0xff]  ;;  %s1691_s25 = scalar_lea.vmem (%p1452_p4), %s1827_s4, %s1131_s20  }
  0x17   : > { %v277_v4 = vld [vmem:[%s1475_s7 + $0x80] sm:$0xff]  ;;  %1172 = vmatprep.mubr.msk.f32.mxu0 %vm302_vm0, %v261_v3  ;;  %v278_v6 = vld [vmem:[%s1475_s7 + $0x88] sm:$0xff]  ;;  %v279_v8 = vld [vmem:[%s1475_s7 + $0x90] sm:$0xff] }
  0x18   : > { %1196 = vmatprep.mubr.msk.f32.mxu1 %vm302_vm0, %v277_v4  ;;  %1173 = vmatmul.mubr.msk.f32.vlgmr.msra.gmra.mrb[0].mxu0 %vm302_vm0, %v262_v5  ;;  %v264_v9 = vld [vmem:[%s1475_s7 + $0x18] sm:$0xff]  ;;  %v265_v11 = vld [vmem:[%s1475_s7 + $0x20] sm:$0xff]  ;;  %v266_v13 = vld [vmem:[%s1475_s7 + $0x28] sm:$0xff] }
  0x19   : > { %1197 = vmatmul.mubr.msk.f32.vlgmr.msra.gmra.mrb[0].mxu1 %vm302_vm0, %v278_v6  ;;  %1175 = vmatprep.mubr.msk.f32.mxu0 %vm302_vm0, %v263_v7  ;;  %v280_v10 = vld [vmem:[%s1475_s7 + $0x98] sm:$0xff]  ;;  %v281_v12 = vld [vmem:[%s1475_s7 + $0xa0] sm:$0xff]  ;;  %v282_v14 = vld [vmem:[%s1475_s7 + $0xa8] sm:$0xff] }
  0x1a   : > { %1199 = vmatprep.mubr.msk.f32.mxu1 %vm302_vm0, %v279_v8  ;;  %v267_v15 = vld [vmem:[%s1475_s7 + $0x30] sm:$0xff]  ;;  %v268_v17 = vld [vmem:[%s1475_s7 + $0x38] sm:$0xff]  ;;  %v269_v19 = vld [vmem:[%s1475_s7 + $0x40] sm:$0xff] }
  0x1b   : > { %v283_v16 = vld [vmem:[%s1475_s7 + $0xb0] sm:$0xff]  ;;  %v284_v18 = vld [vmem:[%s1475_s7 + $0xb8] sm:$0xff]  ;;  %v285_v20 = vld [vmem:[%s1475_s7 + $0xc0] sm:$0xff] }
  0x1c   : > { %1176 = vmatmul.mubr.msk.f32.gmra.mrb[2].mxu0 %vm302_vm0, %v264_v9  ;;  %v270_v21 = vld [vmem:[%s1475_s7 + $0x48] sm:$0xff]  ;;  %v271_v23 = vld [vmem:[%s1475_s7 + $0x50] sm:$0xff]  ;;  %v272_v25 = vld [vmem:[%s1475_s7 + $0x58] sm:$0xff] }
  0x1d   : > { %1200 = vmatmul.mubr.msk.f32.gmra.mrb[2].mxu1 %vm302_vm0, %v280_v10  ;;  %1178 = vmatprep.mubr.msk.f32.mxu0 %vm302_vm0, %v265_v11  ;;  %v286_v22 = vld [vmem:[%s1475_s7 + $0xc8] sm:$0xff]  ;;  %v287_v24 = vld [vmem:[%s1475_s7 + $0xd0] sm:$0xff]  ;;  %v288_v26 = vld [vmem:[%s1475_s7 + $0xd8] sm:$0xff] }
  0x1e   : > { %1202 = vmatprep.mubr.msk.f32.mxu1 %vm302_vm0, %v281_v12  ;;  %v273_v27 = vld [vmem:[%s1475_s7 + $0x60] sm:$0xff]  ;;  %v274_v29 = vld [vmem:[%s1475_s7 + $0x68] sm:$0xff]  ;;  %v275_v31 = vld [vmem:[%s1475_s7 + $0x70] sm:$0xff] }
  0x1f   : > { %v289_v28 = vld [vmem:[%s1475_s7 + $0xe0] sm:$0xff]  ;;  %v290_v30 = vld [vmem:[%s1475_s7 + $0xe8] sm:$0xff]  ;;  %v291_v32 = vld [vmem:[%s1475_s7 + $0xf0] sm:$0xff] }
  0x20   : > { %1179 = vmatmul.mubr.msk.f32.gmra.mrb[4].mxu0 %vm302_vm0, %v266_v13  ;;  %v276_v33 = vld [vmem:[%s1475_s7 + $0x78] sm:$0xff]  ;;  %v625_v37 = vld [vmem:[%s1547_s11 + $0x8] sm:$0xff]  ;;  %v624_v43 = vld [vmem:[%s1547_s11] sm:$0xff] }
  0x21   : > { %1203 = vmatmul.mubr.msk.f32.gmra.mrb[4].mxu1 %vm302_vm0, %v282_v14  ;;  %1181 = vmatprep.mubr.msk.f32.mxu0 %vm302_vm0, %v267_v15  ;;  %v292_v34 = vld [vmem:[%s1475_s7 + $0xf8] sm:$0xff]  ;;  %v641_v39 = vld [vmem:[%s1547_s11 + $0x88] sm:$0xff]  ;;  %v640_v45 = vld [vmem:[%s1547_s11 + $0x80] sm:$0xff] }
  0x22   : > { %1205 = vmatprep.mubr.msk.f32.mxu1 %vm302_vm0, %v283_v16  ;;  %v627_v53 = vld [vmem:[%s1547_s11 + $0x18] sm:$0xff]  ;;  %v626_v59 = vld [vmem:[%s1547_s11 + $0x10] sm:$0xff]  ;;  %v629_v5 = vld [vmem:[%s1547_s11 + $0x28] sm:$0xff] }
  0x23   : > { %v643_v55 = vld [vmem:[%s1547_s11 + $0x98] sm:$0xff]  ;;  %v642_v61 = vld [vmem:[%s1547_s11 + $0x90] sm:$0xff]  ;;  %v645_v7 = vld [vmem:[%s1547_s11 + $0xa8] sm:$0xff] }
  0x24   : > { %1182 = vmatmul.mubr.msk.f32.gmra.mrb[6].mxu0 %vm302_vm0, %v268_v17  ;;  %v628_v11 = vld [vmem:[%s1547_s11 + $0x20] sm:$0xff] }
  0x25   : > { %1206 = vmatmul.mubr.msk.f32.gmra.mrb[6].mxu1 %vm302_vm0, %v284_v18  ;;  %1184 = vmatprep.mubr.msk.f32.mxu0 %vm302_vm0, %v269_v19  ;;  %v644_v13 = vld [vmem:[%s1547_s11 + $0xa0] sm:$0xff] }
  0x26   : > { %1208 = vmatprep.mubr.msk.f32.mxu1 %vm302_vm0, %v285_v20 }
  0x28   : > { %1185 = vmatmul.mubr.msk.f32.gmra.mrb[8].mxu0 %vm302_vm0, %v270_v21  ;;  %v631_v21 = vld [vmem:[%s1547_s11 + $0x38] sm:$0xff] }
  0x29   : > { %1209 = vmatmul.mubr.msk.f32.gmra.mrb[8].mxu1 %vm302_vm0, %v286_v22  ;;  %1187 = vmatprep.mubr.msk.f32.mxu0 %vm302_vm0, %v271_v23  ;;  %v647_v23 = vld [vmem:[%s1547_s11 + $0xb8] sm:$0xff] }
  0x2a   : > { %1211 = vmatprep.mubr.msk.f32.mxu1 %vm302_vm0, %v287_v24 }
  0x2c   : > { %1188 = vmatmul.mubr.msk.f32.gmra.mrb[10].mxu0 %vm302_vm0, %v272_v25 }
  0x2d   : > { %1212 = vmatmul.mubr.msk.f32.gmra.mrb[10].mxu1 %vm302_vm0, %v288_v26  ;;  %1190 = vmatprep.mubr.msk.f32.mxu0 %vm302_vm0, %v273_v27  ;;  %v630_v27 = vld [vmem:[%s1547_s11 + $0x30] sm:$0xff] }
  0x2e   : > { %1214 = vmatprep.mubr.msk.f32.mxu1 %vm302_vm0, %v289_v28 }
  0x30   : > { %1191 = vmatmul.mubr.msk.f32.gmra.mrb[12].mxu0 %vm302_vm0, %v274_v29  ;;  %v646_v29 = vld [vmem:[%s1547_s11 + $0xb0] sm:$0xff] }
  0x31   : > { %1215 = vmatmul.mubr.msk.f32.gmra.mrb[12].mxu1 %vm302_vm0, %v290_v30  ;;  %1193 = vmatprep.mubr.msk.f32.mxu0 %vm302_vm0, %v275_v31 }
  0x32   : > { %1217 = vmatprep.mubr.msk.f32.mxu1 %vm302_vm0, %v291_v32 }
  0x34   : > { %1194 = vmatmul.mubr.msk.f32.gmra.mrb[14].mxu0 %vm302_vm0, %v276_v33 }
  0x35   : > { %1218 = vmatmul.mubr.msk.f32.gmra.mrb[14].mxu1 %vm302_vm0, %v292_v34 }
  0xeb   : > { %v1174_v36 = vpop.f32.mrb[0].mxu0 }
  0xec   : > { %v1198_v38 = vpop.f32.mrb[0].mxu1  ;;  %v471_v40 = vadd.f32 %v1174_v36, %v1552_v35  ;;  %v465_v42 = vpop.f32.mrb[1].mxu0 }
  0xed   : > { %v551_v41 = vadd.f32 %v1198_v38, %v1552_v35  ;;  %v545_v44 = vpop.f32.mrb[1].mxu1  ;;  %v466_v46 = vadd.f32 %v1552_v35, %v465_v42  ;;  %v633_v38 = vld [vmem:[%s1547_s11 + $0x48] sm:$0xff] }
  0xee   : > { %v546_v47 = vadd.f32 %v1552_v35, %v545_v44  ;;  %v657_v48 = vadd.f32 %v625_v37, %v471_v40  ;;  %v649_v40 = vld [vmem:[%s1547_s11 + $0xc8] sm:$0xff]  ;;  %v632_v44 = vld [vmem:[%s1547_s11 + $0x40] sm:$0xff] }
  0xef   : > { %v673_v49 = vadd.f32 %v641_v39, %v551_v41  ;;  %v656_v50 = vadd.f32 %v624_v43, %v466_v46  ;;  %v1177_v52 = vpop.f32.mrb[2].mxu0  ;;  %v648_v46 = vld [vmem:[%s1547_s11 + $0xc0] sm:$0xff] }
  0xf0   : > { %v672_v51 = vadd.f32 %v640_v45, %v546_v47  ;;  %v1201_v54 = vpop.f32.mrb[2].mxu1  ;;  %690 = vst.msk [vmem:[%s1564_s15 + $0x8] sm:$0xff] %vm688_vm1, %v657_v48  ;;  %v481_v56 = vadd.f32 %v1177_v52, %v1552_v35  ;;  %v475_v58 = vpop.f32.mrb[3].mxu0 }
  0xf1   : > { %706 = vst.msk [vmem:[%s1564_s15 + $0x88] sm:$0xff] %vm688_vm1, %v673_v49  ;;  %v561_v57 = vadd.f32 %v1201_v54, %v1552_v35  ;;  %v555_v60 = vpop.f32.mrb[3].mxu1  ;;  %689 = vst.msk [vmem:[%s1564_s15] sm:$0xff] %vm688_vm1, %v656_v50  ;;  %v476_v62 = vadd.f32 %v1552_v35, %v475_v58  ;;  %v635_v54 = vld [vmem:[%s1547_s11 + $0x58] sm:$0xff] }
  0xf2   : > { %705 = vst.msk [vmem:[%s1564_s15 + $0x80] sm:$0xff] %vm688_vm1, %v672_v51  ;;  %v556_v63 = vadd.f32 %v1552_v35, %v555_v60  ;;  %v659_v0 = vadd.f32 %v627_v53, %v481_v56  ;;  %v651_v56 = vld [vmem:[%s1547_s11 + $0xd8] sm:$0xff]  ;;  %v634_v60 = vld [vmem:[%s1547_s11 + $0x50] sm:$0xff] }
  0xf3   : > { %v675_v1 = vadd.f32 %v643_v55, %v561_v57  ;;  %v658_v2 = vadd.f32 %v626_v59, %v476_v62  ;;  %v1180_v4 = vpop.f32.mrb[4].mxu0  ;;  %v650_v62 = vld [vmem:[%s1547_s11 + $0xd0] sm:$0xff] }
  0xf4   : > { %v674_v3 = vadd.f32 %v642_v61, %v556_v63  ;;  %v1204_v6 = vpop.f32.mrb[4].mxu1  ;;  %692 = vst.msk [vmem:[%s1564_s15 + $0x18] sm:$0xff] %vm688_vm1, %v659_v0  ;;  %v491_v8 = vadd.f32 %v1180_v4, %v1552_v35  ;;  %v485_v10 = vpop.f32.mrb[5].mxu0 }
  0xf5   : > { %708 = vst.msk [vmem:[%s1564_s15 + $0x98] sm:$0xff] %vm688_vm1, %v675_v1  ;;  %v571_v9 = vadd.f32 %v1204_v6, %v1552_v35  ;;  %v565_v12 = vpop.f32.mrb[5].mxu1  ;;  %691 = vst.msk [vmem:[%s1564_s15 + $0x10] sm:$0xff] %vm688_vm1, %v658_v2  ;;  %v486_v14 = vadd.f32 %v1552_v35, %v485_v10  ;;  %v637_v6 = vld [vmem:[%s1547_s11 + $0x68] sm:$0xff] }
  0xf6   : > { %707 = vst.msk [vmem:[%s1564_s15 + $0x90] sm:$0xff] %vm688_vm1, %v674_v3  ;;  %v566_v15 = vadd.f32 %v1552_v35, %v565_v12  ;;  %v661_v16 = vadd.f32 %v629_v5, %v491_v8  ;;  %v653_v8 = vld [vmem:[%s1547_s11 + $0xe8] sm:$0xff]  ;;  %v636_v12 = vld [vmem:[%s1547_s11 + $0x60] sm:$0xff] }
  0xf7   : > { %v677_v17 = vadd.f32 %v645_v7, %v571_v9  ;;  %v660_v18 = vadd.f32 %v628_v11, %v486_v14  ;;  %v1183_v20 = vpop.f32.mrb[6].mxu0  ;;  %v652_v14 = vld [vmem:[%s1547_s11 + $0xe0] sm:$0xff] }
  0xf8   : > { %v676_v19 = vadd.f32 %v644_v13, %v566_v15  ;;  %v1207_v22 = vpop.f32.mrb[6].mxu1  ;;  %694 = vst.msk [vmem:[%s1564_s15 + $0x28] sm:$0xff] %vm688_vm1, %v661_v16  ;;  %v501_v24 = vadd.f32 %v1183_v20, %v1552_v35  ;;  %v495_v26 = vpop.f32.mrb[7].mxu0 }
  0xf9   : > { %710 = vst.msk [vmem:[%s1564_s15 + $0xa8] sm:$0xff] %vm688_vm1, %v677_v17  ;;  %v581_v25 = vadd.f32 %v1207_v22, %v1552_v35  ;;  %v575_v28 = vpop.f32.mrb[7].mxu1  ;;  %693 = vst.msk [vmem:[%s1564_s15 + $0x20] sm:$0xff] %vm688_vm1, %v660_v18  ;;  %v496_v30 = vadd.f32 %v1552_v35, %v495_v26  ;;  %v639_v22 = vld [vmem:[%s1547_s11 + $0x78] sm:$0xff] }
  0xfa   : > { %709 = vst.msk [vmem:[%s1564_s15 + $0xa0] sm:$0xff] %vm688_vm1, %v676_v19  ;;  %v576_v31 = vadd.f32 %v1552_v35, %v575_v28  ;;  %v663_v32 = vadd.f32 %v631_v21, %v501_v24  ;;  %v655_v24 = vld [vmem:[%s1547_s11 + $0xf8] sm:$0xff]  ;;  %v638_v28 = vld [vmem:[%s1547_s11 + $0x70] sm:$0xff] }
  0xfb   : > { %v679_v33 = vadd.f32 %v647_v23, %v581_v25  ;;  %v662_v34 = vadd.f32 %v630_v27, %v496_v30  ;;  %v1186_v37 = vpop.f32.mrb[8].mxu0  ;;  %v654_v30 = vld [vmem:[%s1547_s11 + $0xf0] sm:$0xff] }
  0xfc   : > { %v678_v36 = vadd.f32 %v646_v29, %v576_v31  ;;  %v1210_v39 = vpop.f32.mrb[8].mxu1  ;;  %696 = vst.msk [vmem:[%s1564_s15 + $0x38] sm:$0xff] %vm688_vm1, %v663_v32  ;;  %v511_v41 = vadd.f32 %v1186_v37, %v1552_v35  ;;  %v505_v43 = vpop.f32.mrb[9].mxu0 }
  0xfd   : > { %712 = vst.msk [vmem:[%s1564_s15 + $0xb8] sm:$0xff] %vm688_vm1, %v679_v33  ;;  %v591_v42 = vadd.f32 %v1210_v39, %v1552_v35  ;;  %v585_v45 = vpop.f32.mrb[9].mxu1  ;;  %695 = vst.msk [vmem:[%s1564_s15 + $0x30] sm:$0xff] %vm688_vm1, %v662_v34  ;;  %v506_v47 = vadd.f32 %v1552_v35, %v505_v43 }
  0xfe   : > { %711 = vst.msk [vmem:[%s1564_s15 + $0xb0] sm:$0xff] %vm688_vm1, %v678_v36  ;;  %v586_v48 = vadd.f32 %v1552_v35, %v585_v45  ;;  %v665_v49 = vadd.f32 %v633_v38, %v511_v41 }
  0xff   : > { %v681_v50 = vadd.f32 %v649_v40, %v591_v42  ;;  %v664_v51 = vadd.f32 %v632_v44, %v506_v47  ;;  %v1189_v53 = vpop.f32.mrb[10].mxu0 }
 0x100   : > { %v680_v52 = vadd.f32 %v648_v46, %v586_v48  ;;  %v1213_v55 = vpop.f32.mrb[10].mxu1  ;;  %698 = vst.msk [vmem:[%s1564_s15 + $0x48] sm:$0xff] %vm688_vm1, %v665_v49  ;;  %v521_v57 = vadd.f32 %v1189_v53, %v1552_v35  ;;  %v515_v59 = vpop.f32.mrb[11].mxu0 }
 0x101   : > { %714 = vst.msk [vmem:[%s1564_s15 + $0xc8] sm:$0xff] %vm688_vm1, %v681_v50  ;;  %v601_v58 = vadd.f32 %v1213_v55, %v1552_v35  ;;  %v595_v61 = vpop.f32.mrb[11].mxu1  ;;  %697 = vst.msk [vmem:[%s1564_s15 + $0x40] sm:$0xff] %vm688_vm1, %v664_v51  ;;  %v516_v63 = vadd.f32 %v1552_v35, %v515_v59 }
 0x102   : > { %713 = vst.msk [vmem:[%s1564_s15 + $0xc0] sm:$0xff] %vm688_vm1, %v680_v52  ;;  %v596_v0 = vadd.f32 %v1552_v35, %v595_v61  ;;  %v667_v1 = vadd.f32 %v635_v54, %v521_v57 }
 0x103   : > { %v683_v2 = vadd.f32 %v651_v56, %v601_v58  ;;  %v666_v3 = vadd.f32 %v634_v60, %v516_v63  ;;  %v1192_v5 = vpop.f32.mrb[12].mxu0 }
 0x104   : > { %v682_v4 = vadd.f32 %v650_v62, %v596_v0  ;;  %v1216_v7 = vpop.f32.mrb[12].mxu1  ;;  %700 = vst.msk [vmem:[%s1564_s15 + $0x58] sm:$0xff] %vm688_vm1, %v667_v1  ;;  %v531_v9 = vadd.f32 %v1192_v5, %v1552_v35  ;;  %v525_v11 = vpop.f32.mrb[13].mxu0 }
 0x105   : > { %716 = vst.msk [vmem:[%s1564_s15 + $0xd8] sm:$0xff] %vm688_vm1, %v683_v2  ;;  %v611_v10 = vadd.f32 %v1216_v7, %v1552_v35  ;;  %v605_v13 = vpop.f32.mrb[13].mxu1  ;;  %699 = vst.msk [vmem:[%s1564_s15 + $0x50] sm:$0xff] %vm688_vm1, %v666_v3  ;;  %v526_v15 = vadd.f32 %v1552_v35, %v525_v11 }
 0x106   : > { %715 = vst.msk [vmem:[%s1564_s15 + $0xd0] sm:$0xff] %vm688_vm1, %v682_v4  ;;  %v606_v16 = vadd.f32 %v1552_v35, %v605_v13  ;;  %v669_v17 = vadd.f32 %v637_v6, %v531_v9 }
 0x107   : > { %v685_v18 = vadd.f32 %v653_v8, %v611_v10  ;;  %v668_v19 = vadd.f32 %v636_v12, %v526_v15  ;;  %v1195_v21 = vpop.f32.mrb[14].mxu0 }
 0x108   : > { %v684_v20 = vadd.f32 %v652_v14, %v606_v16  ;;  %v1219_v23 = vpop.f32.mrb[14].mxu1  ;;  %702 = vst.msk [vmem:[%s1564_s15 + $0x68] sm:$0xff] %vm688_vm1, %v669_v17  ;;  %v541_v25 = vadd.f32 %v1195_v21, %v1552_v35  ;;  %v535_v27 = vpop.f32.mrb[15].mxu0  ;;  %727 = sbr.rel (!%p1452_p4) target bundleno = 327 (0x147), region = 40 }
 0x109   : > { %718 = vst.msk [vmem:[%s1564_s15 + $0xe8] sm:$0xff] %vm688_vm1, %v685_v18  ;;  %v621_v26 = vadd.f32 %v1219_v23, %v1552_v35  ;;  %v615_v29 = vpop.f32.mrb[15].mxu1  ;;  %701 = vst.msk [vmem:[%s1564_s15 + $0x60] sm:$0xff] %vm688_vm1, %v668_v19  ;;  %v536_v31 = vadd.f32 %v1552_v35, %v535_v27 }
 0x10a   : > { %717 = vst.msk [vmem:[%s1564_s15 + $0xe0] sm:$0xff] %vm688_vm1, %v684_v20  ;;  %v616_v32 = vadd.f32 %v1552_v35, %v615_v29  ;;  %v671_v33 = vadd.f32 %v639_v22, %v541_v25 }
 0x10b   : > { %v687_v34 = vadd.f32 %v655_v24, %v621_v26  ;;  %v670_v36 = vadd.f32 %v638_v28, %v536_v31 }
 0x10c   : > { %v686_v37 = vadd.f32 %v654_v30, %v616_v32  ;;  %704 = vst.msk [vmem:[%s1564_s15 + $0x78] sm:$0xff] %vm688_vm1, %v671_v33 }
 0x10d   : > { %720 = vst.msk [vmem:[%s1564_s15 + $0xf8] sm:$0xff] %vm688_vm1, %v687_v34  ;;  %703 = vst.msk [vmem:[%s1564_s15 + $0x70] sm:$0xff] %vm688_vm1, %v670_v36 }
 0x10e   : > { %719 = vst.msk [vmem:[%s1564_s15 + $0xf0] sm:$0xff] %vm688_vm1, %v686_v37 }
 0x10f   : > { %s1838_s17 = smov (!%p730_p8, %s729_s17), 32 }
 0x110   : > { %s1116_s26 = sshll.u32 %s1838_s17, 7 }
 0x111   : > { %p1119_p9 = scmp.eq.s32.totalorder %s1116_s26, 0 }
 0x112   : > { %s1697_s27 = sshrl.u32 (!%p1119_p9), %s1838_s17, 5 }
 0x113   : > { %738 = sbr.rel (%p1119_p9) target bundleno = 327 (0x147), region = 44  ;;  %p1120_p10 = scmp.le.s32.totalorder (!%p1119_p9), %s1697_s27, 0 }
 0x11a   : > { %1022 = sbr.rel (%p1120_p10) target bundleno = 306 (0x132), region = 123  ;;  %s1829_s18 = smov (!%p1120_p10), %s1691_s25 }
 0x11b   : > { %s1830_s23 = smov (!%p1120_p10), %s1564_s15  ;;  %s1706_s28 = smov (!%p1120_p10), 0  }
 0x11c   : > { %s1708_s29 = smov (!%p1120_p10), 0  }
 0x121 LB: >> { %v862_v35 = vld [vmem:[%s1376_s23] sm:$0xff]  ;;  %v864_v38 = vld [vmem:[%s1376_s23 + $0x8] sm:$0xff]  ;;  %v866_v39 = vld [vmem:[%s1376_s23 + $0x10] sm:$0xff]  ;;  %s926_s30 = sadd.s32 1, %s1380_s28  ;;  %s856_s29 = sadd.s32 1, %s1384_s29   ;;  %s1384_s29 = sphi %s1708_s29, %s856_s29   ;;  %s1380_s28 = sphi %s1706_s28, %s1833_s28   ;;  %s1376_s23 = sphi %s1830_s23, %s1832_s23   ;;  %s1372_s18 = sphi %s1829_s18, %s1831_s18  }
 0x122   : >> { %863 = vst [vmem:[%s1372_s18] sm:$0xff] %v862_v35  ;;  %865 = vst [vmem:[%s1372_s18 + $0x8] sm:$0xff] %v864_v38  ;;  %v868_v40 = vld [vmem:[%s1376_s23 + $0x18] sm:$0xff]  ;;  %v870_v41 = vld [vmem:[%s1376_s23 + $0x20] sm:$0xff]  ;;  %p927_p11 = scmp.ge.s32.totalorder %s926_s30, %s1697_s27  ;;  %p855_p12 = scmp.ge.s32.totalorder %s856_s29, %s1697_s27 }
 0x123   : >> { %867 = vst [vmem:[%s1372_s18 + $0x10] sm:$0xff] %v866_v39  ;;  %v872_v42 = vld [vmem:[%s1376_s23 + $0x28] sm:$0xff]  ;;  %869 = vst [vmem:[%s1372_s18 + $0x18] sm:$0xff] %v868_v40  ;;  %v874_v43 = vld [vmem:[%s1376_s23 + $0x30] sm:$0xff] }
 0x124   : >> { %871 = vst [vmem:[%s1372_s18 + $0x20] sm:$0xff] %v870_v41  ;;  %873 = vst [vmem:[%s1372_s18 + $0x28] sm:$0xff] %v872_v42  ;;  %v876_v44 = vld [vmem:[%s1376_s23 + $0x38] sm:$0xff]  ;;  %v878_v45 = vld [vmem:[%s1376_s23 + $0x40] sm:$0xff]  ;;  %s1840_s30 = smov (%p927_p11, %s926_s30), 0 }
 0x125   : >> { %875 = vst [vmem:[%s1372_s18 + $0x30] sm:$0xff] %v874_v43  ;;  %877 = vst [vmem:[%s1372_s18 + $0x38] sm:$0xff] %v876_v44  ;;  %v880_v46 = vld [vmem:[%s1376_s23 + $0x48] sm:$0xff]  ;;  %v882_v47 = vld [vmem:[%s1376_s23 + $0x50] sm:$0xff]  ;;  %s1121_s5 = sshll.u32 %s1840_s30, 8  ;;  %s1833_s28 = smov %s1840_s30 }
 0x126   : >> { %879 = vst [vmem:[%s1372_s18 + $0x40] sm:$0xff] %v878_v45  ;;  %v884_v48 = vld [vmem:[%s1376_s23 + $0x58] sm:$0xff]  ;;  %881 = vst [vmem:[%s1372_s18 + $0x48] sm:$0xff] %v880_v46  ;;  %v886_v49 = vld [vmem:[%s1376_s23 + $0x60] sm:$0xff]  ;;  %s1764_s6 = scalar_lea.vmem %s1564_s15, %s1121_s5 [#allocation2]   ;;  %s932_s7 = scalar_lea.vmem %s1691_s25, %s1121_s5  }
 0x127   : >> { %883 = vst [vmem:[%s1372_s18 + $0x50] sm:$0xff] %v882_v47  ;;  %885 = vst [vmem:[%s1372_s18 + $0x58] sm:$0xff] %v884_v48  ;;  %v888_v50 = vld [vmem:[%s1376_s23 + $0x68] sm:$0xff]  ;;  %v890_v51 = vld [vmem:[%s1376_s23 + $0x70] sm:$0xff] }
 0x128   : >> { %887 = vst [vmem:[%s1372_s18 + $0x60] sm:$0xff] %v886_v49  ;;  %889 = vst [vmem:[%s1372_s18 + $0x68] sm:$0xff] %v888_v50  ;;  %v892_v52 = vld [vmem:[%s1376_s23 + $0x78] sm:$0xff]  ;;  %v894_v53 = vld [vmem:[%s1376_s23 + $0x80] sm:$0xff] }
 0x129   : >> { %891 = vst [vmem:[%s1372_s18 + $0x70] sm:$0xff] %v890_v51  ;;  %v896_v54 = vld [vmem:[%s1376_s23 + $0x88] sm:$0xff]  ;;  %893 = vst [vmem:[%s1372_s18 + $0x78] sm:$0xff] %v892_v52  ;;  %v898_v55 = vld [vmem:[%s1376_s23 + $0x90] sm:$0xff] }
 0x12a   : >> { %895 = vst [vmem:[%s1372_s18 + $0x80] sm:$0xff] %v894_v53  ;;  %897 = vst [vmem:[%s1372_s18 + $0x88] sm:$0xff] %v896_v54  ;;  %v900_v56 = vld [vmem:[%s1376_s23 + $0x98] sm:$0xff]  ;;  %v902_v57 = vld [vmem:[%s1376_s23 + $0xa0] sm:$0xff] }
 0x12b   : >> { %899 = vst [vmem:[%s1372_s18 + $0x90] sm:$0xff] %v898_v55  ;;  %901 = vst [vmem:[%s1372_s18 + $0x98] sm:$0xff] %v900_v56  ;;  %v904_v58 = vld [vmem:[%s1376_s23 + $0xa8] sm:$0xff]  ;;  %v906_v59 = vld [vmem:[%s1376_s23 + $0xb0] sm:$0xff]  ;;  %858 = sbr.rel (!%p855_p12) target bundleno = 289 (0x121), region = 129 }
 0x12c   : >> { %903 = vst [vmem:[%s1372_s18 + $0xa0] sm:$0xff] %v902_v57  ;;  %v908_v60 = vld [vmem:[%s1376_s23 + $0xb8] sm:$0xff]  ;;  %905 = vst [vmem:[%s1372_s18 + $0xa8] sm:$0xff] %v904_v58  ;;  %v910_v61 = vld [vmem:[%s1376_s23 + $0xc0] sm:$0xff] }
 0x12d   : >> { %907 = vst [vmem:[%s1372_s18 + $0xb0] sm:$0xff] %v906_v59  ;;  %909 = vst [vmem:[%s1372_s18 + $0xb8] sm:$0xff] %v908_v60  ;;  %v912_v62 = vld [vmem:[%s1376_s23 + $0xc8] sm:$0xff]  ;;  %v914_v63 = vld [vmem:[%s1376_s23 + $0xd0] sm:$0xff] }
 0x12e   : >> { %911 = vst [vmem:[%s1372_s18 + $0xc0] sm:$0xff] %v910_v61  ;;  %913 = vst [vmem:[%s1372_s18 + $0xc8] sm:$0xff] %v912_v62  ;;  %v916_v0 = vld [vmem:[%s1376_s23 + $0xd8] sm:$0xff]  ;;  %v918_v1 = vld [vmem:[%s1376_s23 + $0xe0] sm:$0xff] }
 0x12f   : >> { %915 = vst [vmem:[%s1372_s18 + $0xd0] sm:$0xff] %v914_v63  ;;  %v920_v2 = vld [vmem:[%s1376_s23 + $0xe8] sm:$0xff]  ;;  %917 = vst [vmem:[%s1372_s18 + $0xd8] sm:$0xff] %v916_v0  ;;  %v922_v3 = vld [vmem:[%s1376_s23 + $0xf0] sm:$0xff] }
 0x130   : >> { %919 = vst [vmem:[%s1372_s18 + $0xe0] sm:$0xff] %v918_v1  ;;  %921 = vst [vmem:[%s1372_s18 + $0xe8] sm:$0xff] %v920_v2  ;;  %v924_v4 = vld [vmem:[%s1376_s23 + $0xf8] sm:$0xff]  ;;  %s1832_s23 = smov %s1764_s6 }
 0x131   : >> { %923 = vst [vmem:[%s1372_s18 + $0xf0] sm:$0xff] %v922_v3  ;;  %925 = vst [vmem:[%s1372_s18 + $0xf8] sm:$0xff] %v924_v4  ;;  %s1831_s18 = smov %s932_s7 }
 0x132 PF: > { %s1805_s8 = sand.u32 31, %s1838_s17   ;;  %s1132_s9 = sshll.u32 %s1697_s27, 8 }
 0x133   : > { %s937_s10 = scalar_lea.vmem %s1564_s15, %s1132_s9 [#allocation2]   ;;  %s939_s11 = scalar_lea.vmem %s1691_s25, %s1132_s9  }
 0x134   : > { %p1126_p13 = scmp.le.s32.totalorder %s1805_s8, 0 }
 0x135   : > { %s1386_s12 = smov (!%p1126_p13), %s939_s11   ;;  %s1390_s13 = smov (!%p1126_p13), %s937_s10  }
 0x136   : > { %1036 = sbr.rel (%p1126_p13) target bundleno = 327 (0x147), region = 134  ;;  %s1394_s14 = smov (!%p1126_p13), 0  }
 0x137   : > { %s1398_s20 = smov (!%p1126_p13), 0  }
 0x13d LB: >> { %v949_v5 = vld [vmem:[%s1392_s13] sm:$0xff]  ;;  %s951_s17 = sadd.s32 1, %s1396_s14  ;;  %s943_s20 = sadd.s32 1, %s1400_s20   ;;  %s1400_s20 = sphi %s1398_s20, %s943_s20   ;;  %s1396_s14 = sphi %s1394_s14, %s1395_s14   ;;  %s1392_s13 = sphi %s1390_s13, %s956_s13   ;;  %s1388_s12 = sphi %s1386_s12, %s957_s12  }
 0x13e   : >> { %950 = vst [vmem:[%s1388_s12] sm:$0xff] %v949_v5  ;;  %p952_p0 = scmp.ge.s32.totalorder %s951_s17, %s1805_s8  ;;  %p942_p1 = scmp.ge.s32.totalorder %s943_s20, %s1805_s8 }
 0x140   : >> { %s1842_s17 = smov (%p952_p0, %s951_s17), 0  ;;  %945 = sbr.rel (!%p942_p1) target bundleno = 317 (0x13d), region = 140 }
 0x141   : >> { %s1127_s15 = sshll.u32 %s1842_s17, 3  ;;  %s1395_s14 = smov %s1842_s17  }
 0x142   : >> { %s956_s13 = scalar_lea.vmem %s937_s10, %s1127_s15 [#allocation2]   ;;  %s957_s12 = scalar_lea.vmem %s939_s11, %s1127_s15  }
 0x147 PF: > { %p11_p2 = scmp.ge.s32.totalorder %s1442_s19, 4   ;;  %s1834_s15 = smov %s1364_s16 }
 0x148   : > { %s1835_s16 = smov %s1450_s22  ;;  %s1836_s17 = smov %s1442_s19 }
 0x149   :  { %13 = sbr.rel (!%p11_p2) target bundleno = 2 (0x2), region = 151 }

</bundles_post_ra>
